<compile_context>
chip_gen: v6e
topology: v6e:2x2x1
jax: 0.10.0
libtpu: 0.0.40
codegen_flags: <defaults>
</compile_context>

<pallas_src>
import math
from functools import partial

import jax
import jax.numpy as jnp
from jax import lax
from jax.experimental import pallas as pl
from jax.experimental.pallas import tpu as pltpu


def _round_up(x, m):
    return ((x + m - 1) // m) * m


def _largest_divisor_tile(dim_aligned, align, target):
    """Largest multiple of `align` that divides `dim_aligned` and is <= target."""
    if dim_aligned <= target:
        return dim_aligned
    q = dim_aligned // align
    best = 1
    d = 1
    while d * d <= q:
        if q % d == 0:
            for c in (d, q // d):
                if c * align <= target and c > best:
                    best = c
        d += 1
    return best * align


def _choose_tile_and_pad(dim, align, target):
    """Pick a tile near `target` and the padded dim it divides.

    Prefer a divisor of round_up(dim, align) (no round-up-to-tile blowup);
    fall back to a full target tile only when the divisor tile is tiny AND
    the extra padding stays under ~12.5%.
    """
    aligned = _round_up(dim, align)
    t = _largest_divisor_tile(aligned, align, target)
    if 2 * t < min(target, aligned):
        padded = _round_up(aligned, target)
        if padded * 8 <= aligned * 9:
            return target, padded
    return t, aligned


def _vmem_limit_bytes():
    # Generation-aware VMEM budget with ~16 MiB headroom for compiler scratch:
    # v7x (64 MiB) -> 48 MiB, v5e/v6e (128 MiB) -> 112 MiB.
    try:
        cap = int(getattr(pltpu.get_tpu_info(), "vmem_capacity_bytes", 64 << 20))
    except Exception:
        cap = 64 << 20
    return max(32 << 20, cap - (16 << 20))


def _linear_kernel(*refs, has_bias, use_acc):
    # Ref order: inputs (x, w[, b]), output o, then scratch ([acc]).
    if has_bias:
        x_ref, w_ref, b_ref, o_ref = refs[:4]
        rest = refs[4:]
    else:
        x_ref, w_ref, o_ref = refs[:3]
        rest = refs[3:]
    acc_ref = rest[0] if use_acc else o_ref  # f32 output accumulates in place

    k = pl.program_id(2)
    nk = pl.num_programs(2)

    # W keeps the PyTorch (out, in) layout: contract x (tm, tk) with w (tn, tk)
    # along their last axes -> (tm, tn). No wrapper-side transpose of W.
    part = lax.dot_general(
        x_ref[...],
        w_ref[...],
        dimension_numbers=(((1,), (1,)), ((), ())),
        preferred_element_type=jnp.float32,
    )

    @pl.when(k == 0)
    def _():
        acc_ref[...] = part  # init with first partial (no zeros pass)

    @pl.when(k != 0)
    def _():
        acc_ref[...] += part

    if has_bias or use_acc:
        @pl.when(k == nk - 1)
        def _():
            res = acc_ref[...]
            if has_bias:
                res = res + b_ref[...]  # bias stays f32 into the add
            o_ref[...] = res.astype(o_ref.dtype)


def linear(x, weight, bias=None, *, tm=None, tn=None, tk=None):
    """Pallas equivalent of torch.nn.functional.linear.

    x:      (N, in_features)
    weight: (out_features, in_features)   [PyTorch convention, NOT transposed]
    bias:   (out_features,) or None
    returns (N, out_features)
    """
    n_rows, in_features = x.shape
    out_features, in_features_w = weight.shape
    assert in_features_w == in_features
    out_dtype = x.dtype

    x_item = jnp.dtype(x.dtype).itemsize
    w_item = jnp.dtype(weight.dtype).itemsize
    out_item = jnp.dtype(out_dtype).itemsize

    # Sub-32-bit dtypes pack along sublanes: f32 -> 8, bf16 -> 16, int8/fp8 -> 32.
    sub = max(8, 32 // x_item)
    m_aligned = _round_up(n_rows, sub)

    # Tile targets: big MXU-friendly tiles for GEMM shapes, and a small-M
    # (GEMV / decode) path with a single M block and wide lane-dense W tiles.
    if m_aligned <= 64:
        target_m, target_n, target_k = m_aligned, 2048, 2048
    else:
        target_m, target_n, target_k = 512, 512, 1024
    if tm is not None:
        target_m = tm
    if tn is not None:
        target_n = tn
    if tk is not None:
        target_k = tk

    has_bias = bias is not None
    use_acc = out_dtype != jnp.float32
    budget = _vmem_limit_bytes()

    # Pick tiles; shrink targets only if the double-buffered footprint would
    # not fit in the VMEM budget.
    while True:
        tm_, m_pad = _choose_tile_and_pad(n_rows, sub, target_m)
        tk_, k_pad = _choose_tile_and_pad(in_features, 128, target_k)
        tn_, n_pad = _choose_tile_and_pad(out_features, 128, target_n)
        footprint = 2 * (tm_ * tk_ * x_item + tn_ * tk_ * w_item
                         + tm_ * tn_ * out_item)
        footprint += (tm_ * tn_ * 4) if use_acc else 0
        footprint += (2 * tn_ * 4) if has_bias else 0
        if footprint <= budget or max(target_m, target_n, target_k) <= 128:
            break
        if target_k >= max(target_m, target_n):
            target_k = max(128, target_k // 2)
        elif target_n >= target_m:
            target_n = max(128, target_n // 2)
        else:
            target_m = max(sub, target_m // 2)
    tm_, tn_, tk_ = int(tm_), int(tn_), int(tk_)

    grid_m = m_pad // tm_
    grid_n = n_pad // tn_
    grid_k = k_pad // tk_

    # v7x has 2 TensorCores: make sure the 'parallel' grid has >= 2 blocks so
    # both cores get work (harmless on 1-TC chips).
    if grid_m * grid_n == 1 and n_pad >= 256:
        tn_ = _largest_divisor_tile(n_pad, 128, n_pad // 2)
        grid_n = n_pad // tn_

    grid = (grid_m, grid_n, grid_k)

    # Zero-pad to hardware alignment only (K padding contributes zero to the dot).
    if (m_pad, k_pad) != x.shape:
        x = jnp.pad(x, ((0, m_pad - n_rows), (0, k_pad - in_features)))
    if (n_pad, k_pad) != weight.shape:
        weight = jnp.pad(weight, ((0, n_pad - out_features), (0, k_pad - in_features)))

    x_spec = pl.BlockSpec((tm_, tk_), lambda i, j, k: (i, k))
    w_spec = pl.BlockSpec((tn_, tk_), lambda i, j, k: (j, k))   # (out, in) layout
    o_spec = pl.BlockSpec((tm_, tn_), lambda i, j, k: (i, j))

    flops = 2 * m_pad * n_pad * k_pad
    bytes_accessed = (
        grid[1] * m_pad * k_pad * x_item      # x re-read once per N tile
        + grid[0] * n_pad * k_pad * w_item    # W re-read once per M tile
        + m_pad * n_pad * out_item            # y written once
        + (grid[0] * n_pad * 4 if has_bias else 0)
    )
    cost = pl.CostEstimate(flops=int(flops), transcendentals=0,
                           bytes_accessed=int(bytes_accessed))

    compiler_params = pltpu.CompilerParams(
        dimension_semantics=("parallel", "parallel", "arbitrary"),
        vmem_limit_bytes=int(budget),
    )

    in_specs = [x_spec, w_spec]
    args = [x, weight]
    if has_bias:
        b2d = bias.astype(jnp.float32).reshape(1, out_features)
        if n_pad != out_features:
            b2d = jnp.pad(b2d, ((0, 0), (0, n_pad - out_features)))
        in_specs.append(pl.BlockSpec((1, tn_), lambda i, j, k: (0, j)))
        args.append(b2d)

    scratch = [pltpu.VMEM((tm_, tn_), jnp.float32)] if use_acc else []

    out = pl.pallas_call(
        partial(_linear_kernel, has_bias=has_bias, use_acc=use_acc),
        out_shape=jax.ShapeDtypeStruct((m_pad, n_pad), out_dtype),
        grid_spec=pltpu.PrefetchScalarGridSpec(
            num_scalar_prefetch=0,
            grid=grid,
            in_specs=in_specs,
            out_specs=o_spec,
            scratch_shapes=scratch,
        ),
        compiler_params=compiler_params,
        cost_estimate=cost,
    )(*args)

    return out[:n_rows, :out_features]


if __name__ == "__main__":
    # Module config: Linear(in_features=32, out_features=16), batch N=8.
    in_features, out_features, batch = 32, 16, 8

    key = jax.random.PRNGKey(0)
    kx, kw = jax.random.split(key)

    # Deterministic Glorot-style init matching reset_parameters():
    # weight ~ Normal(0, sqrt(2 / (in + out))), bias = 0.
    stdv = math.sqrt(2.0 / (in_features + out_features))
    weight = stdv * jax.random.normal(
        kw, (out_features, in_features), dtype=jnp.float32
    )
    bias = jnp.zeros((out_features,), dtype=jnp.float32)

    x = jax.random.normal(kx, (batch, in_features), dtype=jnp.float32)

    # With bias.
    out = jax.block_until_ready(linear(x, weight, bias))
    ref = x @ weight.T + bias[None, :]
    assert out.shape == (batch, out_features)
    assert jnp.allclose(out, ref, atol=1e-5, rtol=1e-5)

    # Without bias (exercises the no-bias / no-epilogue path).
    out_nb = jax.block_until_ready(linear(x, weight, None))
    ref_nb = x @ weight.T
    assert out_nb.shape == (batch, out_features)
    assert jnp.allclose(out_nb, ref_nb, atol=1e-5, rtol=1e-5)

    print("KERNEL_OK")
</pallas_src>

<mosaic_0001>
module attributes {stable_mosaic.version = 11 : i64} {
  func.func @_linear_kernel(%arg0: i32, %arg1: i32, %arg2: i32, %arg3: memref<8x128xf32, #tpu.memory_space<vmem>>, %arg4: memref<128x128xf32, #tpu.memory_space<vmem>>, %arg5: memref<1x128xf32, #tpu.memory_space<vmem>>, %arg6: memref<8x128xf32, #tpu.memory_space<vmem>>) attributes {dimension_semantics = [#tpu.dimension_semantics<parallel>, #tpu.dimension_semantics<parallel>, #tpu.dimension_semantics<arbitrary>], iteration_bounds = array<i64: 1, 1, 1>, scalar_prefetch = 0 : i64, scratch_operands = 0 : i64, tpu.core_type = #tpu.core_type<tc>, window_params = [{transform_indices = @transform_0, window_bounds = array<i64: 8, 128>}, {transform_indices = @transform_1, window_bounds = array<i64: 128, 128>}, {transform_indices = @transform_2, window_bounds = array<i64: 1, 128>}, {transform_indices = @transform_3, window_bounds = array<i64: 8, 128>}]} {
    %c0 = arith.constant 0 : index
    %c0_0 = arith.constant 0 : index
    %0 = vector.load %arg3[%c0, %c0_0] : memref<8x128xf32, #tpu.memory_space<vmem>>, vector<8x128xf32>
    %c0_1 = arith.constant 0 : index
    %c0_2 = arith.constant 0 : index
    %1 = vector.load %arg4[%c0_1, %c0_2] : memref<128x128xf32, #tpu.memory_space<vmem>>, vector<128x128xf32>
    %cst = arith.constant dense<0.000000e+00> : vector<8x128xf32>
    %2 = tpu.matmul %0, %1, %cst {dimension_numbers = #tpu.dot_dimension_numbers<[1], [1], [0], [0], [0, 0, 1, 0], [], []>} : vector<8x128xf32>, vector<128x128xf32>, vector<8x128xf32> -> vector<8x128xf32>
    %c0_i32 = arith.constant 0 : i32
    %3 = arith.cmpi eq, %arg2, %c0_i32 : i32
    %4 = arith.extui %3 : i1 to i32
    %c0_i32_3 = arith.constant 0 : i32
    %5 = arith.cmpi ne, %4, %c0_i32_3 : i32
    scf.if %5 {
      %c0_8 = arith.constant 0 : index
      %c0_9 = arith.constant 0 : index
      %12 = vector.load %arg6[%c0_8, %c0_9] : memref<8x128xf32, #tpu.memory_space<vmem>>, vector<8x128xf32>
      tpu.vector_store %arg6[%c0_8, %c0_9], %2 {strides = array<i32>} : memref<8x128xf32, #tpu.memory_space<vmem>>, vector<8x128xf32>,
    } else {
    }
    %c0_i32_4 = arith.constant 0 : i32
    %6 = arith.cmpi ne, %arg2, %c0_i32_4 : i32
    %7 = arith.extui %6 : i1 to i32
    %c0_i32_5 = arith.constant 0 : i32
    %8 = arith.cmpi ne, %7, %c0_i32_5 : i32
    scf.if %8 {
      %c0_8 = arith.constant 0 : index
      %c0_9 = arith.constant 0 : index
      %12 = vector.load %arg6[%c0_8, %c0_9] : memref<8x128xf32, #tpu.memory_space<vmem>>, vector<8x128xf32>
      %13 = arith.addf %12, %2 : vector<8x128xf32>
      %c0_10 = arith.constant 0 : index
      %c0_11 = arith.constant 0 : index
      %14 = vector.load %arg6[%c0_10, %c0_11] : memref<8x128xf32, #tpu.memory_space<vmem>>, vector<8x128xf32>
      tpu.vector_store %arg6[%c0_10, %c0_11], %13 {strides = array<i32>} : memref<8x128xf32, #tpu.memory_space<vmem>>, vector<8x128xf32>,
    } else {
    }
    %c0_i32_6 = arith.constant 0 : i32
    %9 = arith.cmpi eq, %arg2, %c0_i32_6 : i32
    %10 = arith.extui %9 : i1 to i32
    %c0_i32_7 = arith.constant 0 : i32
    %11 = arith.cmpi ne, %10, %c0_i32_7 : i32
    scf.if %11 {
      %c0_8 = arith.constant 0 : index
      %c0_9 = arith.constant 0 : index
      %12 = vector.load %arg6[%c0_8, %c0_9] : memref<8x128xf32, #tpu.memory_space<vmem>>, vector<8x128xf32>
      %c0_10 = arith.constant 0 : index
      %c0_11 = arith.constant 0 : index
      %13 = vector.load %arg5[%c0_10, %c0_11] : memref<1x128xf32, #tpu.memory_space<vmem>>, vector<1x128xf32>
      %14 = vector.broadcast %13 : vector<1x128xf32> to vector<8x128xf32>
      %15 = arith.addf %12, %14 : vector<8x128xf32>
      %c0_12 = arith.constant 0 : index
      %c0_13 = arith.constant 0 : index
      %16 = vector.load %arg6[%c0_12, %c0_13] : memref<8x128xf32, #tpu.memory_space<vmem>>, vector<8x128xf32>
      tpu.vector_store %arg6[%c0_12, %c0_13], %15 {strides = array<i32>} : memref<8x128xf32, #tpu.memory_space<vmem>>, vector<8x128xf32>,
    } else {
    }
    return
  }
  func.func @transform_0(%arg0: i32, %arg1: i32, %arg2: i32) -> (i32, i32) {
    %c0_i32 = arith.constant 0 : i32
    return %arg0, %arg2 : i32, i32
  }
  func.func @transform_1(%arg0: i32, %arg1: i32, %arg2: i32) -> (i32, i32) {
    %c0_i32 = arith.constant 0 : i32
    return %arg1, %arg2 : i32, i32
  }
  func.func @transform_2(%arg0: i32, %arg1: i32, %arg2: i32) -> (i32, i32) {
    %c0_i32 = arith.constant 0 : i32
    %c0_i32_0 = arith.constant 0 : i32
    return %c0_i32, %arg1 : i32, i32
  }
  func.func @transform_3(%arg0: i32, %arg1: i32, %arg2: i32) -> (i32, i32) {
    %c0_i32 = arith.constant 0 : i32
    return %arg0, %arg1 : i32, i32
  }
}

</mosaic_0001>

<bundles_post_ra>
// kernel: tpu_custom_call.1
= control target key start
LH: loop header
LB: loop body
LE: loop exit
PB: predicated region body
PF: predicated region fallthrough
CT: control target
= control target key end

     0   :  { %8 = vsyncpa [#allocation3], 0  ;;  %s334_s0 = inlined_call_operand.hbm [shape: f32[8,128], index: 0, kind: input, shape index: {}]   ;;  %s335_s1 = inlined_call_operand.hbm [shape: f32[128,128], index: 1, kind: input, shape index: {}]   ;;  %s336_s2 = inlined_call_operand.vmem [shape: f32[1,128], index: 2, kind: input, shape index: {}]   ;;  %s337_s3 = inlined_call_operand.hbm [shape: f32[8,128], index: 3, kind: output, shape index: {}]  }
   0x1   :  { %9 = vsyncpa [#allocation6], 0 }
   0x2   :  { %10 = vsyncpa [#allocation4], 0  ;;  %s295_s12 = smov [#allocation2]   ;;  %s296_s14 = smov [#allocation5]  }
   0x3   :  { %s17_s13 = sshll.u32 %s295_s12, 4  ;;  %s26_s15 = sshll.u32 %s296_s14, 4  ;;  %s18_s13 = int_to_ptr.vmem [resolvable:$true] %s17_s13  ;;  %s27_s15 = int_to_ptr.vmem [resolvable:$true] %s26_s15 }
   0x4   :  { %s237_s16 = scalar_lea.vmem %s18_s13, 128  ;;  %p242_p1 = scmp.lt.s32.totalorder %s18_s13, %s18_s13 }
   0x5   :  { %p238_p0 = scmp.ne.s32.totalorder %s18_s13, %s237_s16  ;;  %p243_p2 = scmp.lt.s32.totalorder %s237_s16, %s237_s16 }
   0x7   :  { %p244_p3 = por %p243_p2, %p242_p1 }
   0x9   :  { %p245_p4 = pnand %p244_p3, %p238_p0 }
   0xb   :  { %248 = shalt.err (!%p245_p4)
}
   0xc   :  { %20 = dma.hbm_to_vmem [thread:$0]  %s334_s0, 128, %s18_s13, [#allocation3]  }
   0xd   :  { %s257_s19 = scalar_lea.vmem %s27_s15, 2048  ;;  %p262_p6 = scmp.lt.s32.totalorder %s27_s15, %s27_s15 }
   0xe   :  { %p258_p5 = scmp.ne.s32.totalorder %s27_s15, %s257_s19  ;;  %p263_p7 = scmp.lt.s32.totalorder %s257_s19, %s257_s19 }
  0x10   :  { %p264_p8 = por %p263_p7, %p262_p6 }
  0x12   :  { %p265_p9 = pnand %p264_p8, %p258_p5 }
  0x14   :  { %268 = shalt.err (!%p265_p9)
}
  0x15   :  { %s297_s20 = smov 128   ;;  %s298_s21 = smov 8  }
  0x16   :  { %32 = dma.hbm_to_vmem [thread:$0]  %s335_s1, 2048, %s27_s15, [#allocation6], %s297_s20, %s297_s20, %s298_s21  }
  0x17   :  { %289 = dma.done.wait [#allocation3], 128  }
  0x18   :  { %290 = vsyncadd [#allocation3], 4294967168 }
  0x19   :  { %291 = dma.done.wait [#allocation6], 2048  }
  0x1a   :  { %292 = vsyncadd [#allocation6], 4294965248  ;;  %v299_v0 = vmov 0.0   ;;  %vm300_vm0 = vmmov 0   ;;  %v57_v1 = vld [vmem:[#allocation5 + $0x78] sm:$0xff]  ;;  %v56_v2 = vld [vmem:[#allocation5 + $0x70] sm:$0xff] }
  0x1b   :  { %187 = vmatprep.subr.mxu0 %v299_v0  ;;  %219 = vmatprep.mubr.msk.f32.mxu0 %vm300_vm0, %v299_v0  ;;  %v55_v3 = vld [vmem:[#allocation5 + $0x68] sm:$0xff]  ;;  %v54_v4 = vld [vmem:[#allocation5 + $0x60] sm:$0xff]  ;;  %v53_v5 = vld [vmem:[#allocation5 + $0x58] sm:$0xff]  ;;  %s301_s24 = smov [#allocation7]  }
  0x1c   :  { %188 = vmatpush3.xpose.msra.mxu0 %v57_v1  ;;  %v52_v6 = vld [vmem:[#allocation5 + $0x50] sm:$0xff]  ;;  %v51_v7 = vld [vmem:[#allocation5 + $0x48] sm:$0xff]  ;;  %v50_v8 = vld [vmem:[#allocation5 + $0x40] sm:$0xff]  ;;  %s159_s25 = sshll.u32 %s301_s24, 4  ;;  %s160_s25 = int_to_ptr.vmem [resolvable:$true] %s159_s25 }
  0x1d   :  { %189 = vmatprep.subr.mxu0 %v299_v0  ;;  %v49_v9 = vld [vmem:[#allocation5 + $0x38] sm:$0xff]  ;;  %v48_v10 = vld [vmem:[#allocation5 + $0x30] sm:$0xff]  ;;  %v47_v11 = vld [vmem:[#allocation5 + $0x28] sm:$0xff]  ;;  %s269_s26 = scalar_lea.vmem %s160_s25, 128  ;;  %p274_p11 = scmp.lt.s32.totalorder %s160_s25, %s160_s25 }
  0x1e   :  { %v46_v12 = vld [vmem:[#allocation5 + $0x20] sm:$0xff]  ;;  %v45_v13 = vld [vmem:[#allocation5 + $0x18] sm:$0xff]  ;;  %v44_v14 = vld [vmem:[#allocation5 + $0x10] sm:$0xff]  ;;  %p270_p10 = scmp.ne.s32.totalorder %s160_s25, %s269_s26  ;;  %p275_p12 = scmp.lt.s32.totalorder %s269_s26, %s269_s26 }
  0x1f   :  { %v43_v15 = vld [vmem:[#allocation5 + $0x8] sm:$0xff]  ;;  %v42_v16 = vld [vmem:[#allocation5] sm:$0xff]  ;;  %v41_v17 = vld [vmem:[#allocation2] sm:$0xff] }
  0x20   :  { %190 = vmatpush3.xpose.msra.mxu0 %v56_v2  ;;  %v169_v18 = vld [vmem:[%s336_s2] ss:$0 sm:$0xff]  ;;  %p276_p13 = por %p275_p12, %p274_p11 }
  0x21   :  { %191 = vmatprep.subr.mxu0 %v299_v0 }
  0x22   :  { %p277_p0 = pnand %p276_p13, %p270_p10 }
  0x24   :  { %192 = vmatpush3.xpose.msra.mxu0 %v55_v3 }
  0x25   :  { %193 = vmatprep.subr.mxu0 %v299_v0 }
  0x28   :  { %194 = vmatpush3.xpose.msra.mxu0 %v54_v4 }
  0x29   :  { %195 = vmatprep.subr.mxu0 %v299_v0 }
  0x2c   :  { %196 = vmatpush3.xpose.msra.mxu0 %v53_v5 }
  0x2d   :  { %197 = vmatprep.subr.mxu0 %v299_v0 }
  0x30   :  { %198 = vmatpush3.xpose.msra.mxu0 %v52_v6 }
  0x31   :  { %199 = vmatprep.subr.mxu0 %v299_v0 }
  0x34   :  { %200 = vmatpush3.xpose.msra.mxu0 %v51_v7 }
  0x35   :  { %201 = vmatprep.subr.mxu0 %v299_v0 }
  0x38   :  { %202 = vmatpush3.xpose.msra.mxu0 %v50_v8 }
  0x39   :  { %203 = vmatprep.subr.mxu0 %v299_v0 }
  0x3c   :  { %204 = vmatpush3.xpose.msra.mxu0 %v49_v9 }
  0x3d   :  { %205 = vmatprep.subr.mxu0 %v299_v0 }
  0x40   :  { %206 = vmatpush3.xpose.msra.mxu0 %v48_v10 }
  0x41   :  { %207 = vmatprep.subr.mxu0 %v299_v0 }
  0x44   :  { %208 = vmatpush3.xpose.msra.mxu0 %v47_v11 }
  0x45   :  { %209 = vmatprep.subr.mxu0 %v299_v0 }
  0x48   :  { %210 = vmatpush3.xpose.msra.mxu0 %v46_v12 }
  0x49   :  { %211 = vmatprep.subr.mxu0 %v299_v0 }
  0x4c   :  { %212 = vmatpush3.xpose.msra.mxu0 %v45_v13 }
  0x4d   :  { %213 = vmatprep.subr.mxu0 %v299_v0 }
  0x50   :  { %214 = vmatpush3.xpose.msra.mxu0 %v44_v14 }
  0x51   :  { %215 = vmatprep.subr.mxu0 %v299_v0 }
  0x54   :  { %216 = vmatpush3.xpose.msra.mxu0 %v43_v15 }
  0x55   :  { %217 = vmatprep.subr.mxu0 %v299_v0 }
  0x58   :  { %218 = vmatpush3.xpose.msra.mxu0 %v42_v16 }
  0x5b   :  { %220 = vmatmul.mubr.f32.vlgmr.msra.gmra.mxu0 %v41_v17 }
 0x11b   :  { %v124_v19 = vpop.f32.mrf.mxu0 }
 0x11c   :  { %v151_v20 = vadd.f32 %v169_v18, %v124_v19 }
 0x11d   :  { %v221_v21 = vpop.f32.mrf.mxu0 }
 0x11e   :  { %152 = vst [vmem:[#allocation7] sm:$0xff] %v151_v20 }
 0x11f   :  { %280 = shalt.err (!%p277_p0)
}
 0x120   :  { %162 = dma.vmem_to_hbm [thread:$0]  %s160_s25, 128, %s337_s3, [#allocation4]  }
 0x121   :  { %293 = dma.done.wait [#allocation4], 128  }
 0x122   :  { %294 = vsyncadd [#allocation4], 4294967168 }
 0x123   :  { %166 = vsyncpa [#allocation3], 1 }
 0x124   :  { %167 = vsyncpa [#allocation6], 1 }
 0x125   :  { %168 = vsyncpa [#allocation4], 1 }

</bundles_post_ra>
